<compile_context>
chip_gen: v5e
topology: v5e:2x2
jax: 0.10.0
libtpu: 0.0.40
codegen_flags: <defaults>
</compile_context>

<pallas_src>
import math

import jax
import jax.numpy as jnp
from jax.experimental import pallas as pl
from jax.experimental.pallas import tpu as pltpu

# ---- problem sizes (small, consistent with a video recognizer forward) ----
N = 2            # number of videos in the small (spec-sized) batch
NUM_CLIPS = 4    # clips per video (averaged by average_clip)
C, H, W = 4, 16, 16
D_IN = C * H * W          # 1024
HIDDEN = 32
NUM_CLASSES = 16

_LANE = 128
_NEG_BIG = -1e30          # bias for padded class columns -> exp underflows to 0


def _round_up(x, m):
    return (x + m - 1) // m * m


def _lcm(a, b):
    return a * b // math.gcd(a, b)


def recognizer_kernel(x_ref, w1_ref, b1_ref, w2_ref, b2_ref, avg_ref, out_ref):
    """Fused backbone + cls_head + average_clip('prob') for one row tile.

    x_ref  : (row_tile, D_IN)      bf16 flattened clips (streamed per grid step)
    w1_ref : (D_IN, HID_PAD) bf16, b1_ref: (1, HID_PAD) f32      (resident)
    w2_ref : (HID_PAD, C_PAD) f32, b2_ref: (1, C_PAD)  f32       (resident)
    avg_ref: (v_tile, row_tile) f32 block-diagonal clip-averaging matrix
    out_ref: (v_tile, C_PAD) f32   lane-dense averaged class probabilities
    """
    # extract_feat: linear backbone + ReLU (bf16 MXU matmul, f32 accumulate)
    h = jnp.dot(x_ref[...], w1_ref[...], preferred_element_type=jnp.float32)
    h = jnp.maximum(h + b1_ref[...], 0.0)

    # cls_head: linear -> per-clip class scores. Padded class columns carry a
    # very negative bias so they contribute nothing to the softmax.
    s = jnp.dot(h, w2_ref[...], preferred_element_type=jnp.float32) + b2_ref[...]

    # average_clip('prob'): softmax over classes (lane axis) ...
    m = jnp.max(s, axis=-1, keepdims=True)
    e = jnp.exp(s - m)
    p = e * pl.reciprocal(jnp.sum(e, axis=-1, keepdims=True), approx=False)

    # ... then mean over the clip axis as a single block-diagonal averaging
    # matmul on the MXU -> one lane-dense whole-block store.
    out_ref[...] = jnp.dot(avg_ref[...], p, preferred_element_type=jnp.float32)


def _make_avg_matrix(v_tile, num_clips):
    """(v_tile, v_tile*num_clips) block-diagonal matrix of 1/num_clips."""
    rows = jnp.arange(v_tile)[:, None]
    cols = jnp.arange(v_tile * num_clips)[None, :]
    return jnp.where(cols // num_clips == rows,
                     jnp.float32(1.0 / num_clips), jnp.float32(0.0))


def recognizer_forward(imgs, w1, b1, w2, b2, *, num_clips, row_tile=128):
    """imgs: (N*num_clips, C, H, W) float32 -> (N, num_classes) averaged probs."""
    M = imgs.shape[0]
    assert M % num_clips == 0, "batch must contain whole videos"
    n_videos = M // num_clips
    d_in = w1.shape[0]
    hidden = w1.shape[1]
    num_classes = w2.shape[1]

    hid_pad = _round_up(hidden, _LANE)
    c_pad = _round_up(num_classes, _LANE)

    # Row tile: multiple of 8 (sublanes) and num_clips (whole videos per tile);
    # when more than one tile, also multiple of 8*num_clips so the per-tile
    # video count stays 8-aligned for the output block.
    if M <= row_tile:
        row_tile = _round_up(M, _lcm(8, num_clips))
    else:
        row_tile = _round_up(row_tile, 8 * num_clips)
    M_pad = _round_up(M, row_tile)
    grid_rows = M_pad // row_tile
    v_tile = row_tile // num_clips
    v_pad = M_pad // num_clips

    # ---- glue reshapes / pads / casts in plain JAX (bf16 x & w1 halve HBM bytes) --
    x = imgs.reshape(M, d_in).astype(jnp.bfloat16)
    x_pad = jnp.pad(x, ((0, M_pad - M), (0, 0)))
    w1_pad = jnp.pad(w1.astype(jnp.bfloat16), ((0, 0), (0, hid_pad - hidden)))
    b1_pad = jnp.pad(b1.astype(jnp.float32), ((0, 0), (0, hid_pad - hidden)))
    w2_pad = jnp.pad(w2.astype(jnp.float32),
                     ((0, hid_pad - hidden), (0, c_pad - num_classes)))
    b2_pad = jnp.pad(b2.astype(jnp.float32), ((0, 0), (0, c_pad - num_classes)),
                     constant_values=_NEG_BIG)
    avg = _make_avg_matrix(v_tile, num_clips)

    out = pl.pallas_call(
        recognizer_kernel,
        out_shape=jax.ShapeDtypeStruct((v_pad, c_pad), jnp.float32),
        grid=(grid_rows,),
        in_specs=[
            pl.BlockSpec((row_tile, d_in), lambda i: (i, 0)),   # x streams per step
            pl.BlockSpec((d_in, hid_pad), lambda i: (0, 0)),    # weights resident
            pl.BlockSpec((1, hid_pad), lambda i: (0, 0)),
            pl.BlockSpec((hid_pad, c_pad), lambda i: (0, 0)),
            pl.BlockSpec((1, c_pad), lambda i: (0, 0)),
            pl.BlockSpec((v_tile, row_tile), lambda i: (0, 0)),  # clip-avg matrix
        ],
        out_specs=pl.BlockSpec((v_tile, c_pad), lambda i: (i, 0)),
        compiler_params=pltpu.CompilerParams(
            dimension_semantics=("parallel",)),
    )(x_pad, w1_pad, b1_pad, w2_pad, b2_pad, avg)

    return out[:n_videos, :num_classes]


def reference_forward(imgs, w1, b1, w2, b2, num_clips):
    """Pure-JAX reference reproducing the PyTorch semantics (same bf16 inputs)."""
    M = imgs.shape[0]
    x = imgs.reshape(M, -1).astype(jnp.bfloat16)
    h = jnp.dot(x, w1.astype(jnp.bfloat16), preferred_element_type=jnp.float32)
    h = jnp.maximum(h + b1.astype(jnp.float32), 0.0)
    s = jnp.dot(h, w2.astype(jnp.float32),
                preferred_element_type=jnp.float32) + b2
    cls_score = s.reshape(M // num_clips, num_clips, -1)   # (N, num_clips, num_classes)
    # average_clip 'prob': softmax(dim=2).mean(dim=1)
    return jax.nn.softmax(cls_score, axis=2).mean(axis=1)


# TODO(synk): forward_train / _parse_losses (loss dict parsing, dist.all_reduce)
# and train_step are training/host-side bookkeeping with no kernel equivalent;
# only the test-time forward (extract_feat + cls_head + average_clip) is implemented.

if __name__ == "__main__":
    key = jax.random.PRNGKey(0)
    k_img, k_w1, k_b1, k_w2, k_b2, k_big = jax.random.split(key, 6)

    # deterministic synthetic parameters (scaled normal init)
    w1 = jax.random.normal(k_w1, (D_IN, HIDDEN), jnp.float32) * (1.0 / jnp.sqrt(D_IN))
    b1 = jax.random.normal(k_b1, (1, HIDDEN), jnp.float32) * 0.01
    w2 = jax.random.normal(k_w2, (HIDDEN, NUM_CLASSES), jnp.float32) * (1.0 / jnp.sqrt(HIDDEN))
    b2 = jax.random.normal(k_b2, (1, NUM_CLASSES), jnp.float32) * 0.01

    # --- spec-sized batch: 2 videos x 4 clips of (4,16,16) frames -------------
    imgs = jax.random.normal(k_img, (N * NUM_CLIPS, C, H, W), jnp.float32)
    out = recognizer_forward(imgs, w1, b1, w2, b2, num_clips=NUM_CLIPS)
    out = jax.block_until_ready(out)
    ref = reference_forward(imgs, w1, b1, w2, b2, NUM_CLIPS)
    assert out.shape == (N, NUM_CLASSES)
    assert jnp.allclose(out, ref, atol=2e-5, rtol=2e-5), "mismatch vs reference (small)"
    assert jnp.allclose(out.sum(axis=-1), jnp.ones((N,)), atol=1e-5)

    # --- batched path: 64 videos x 4 clips = 256 rows -> 2 grid steps of 128 --
    N_BIG = 64
    imgs_big = jax.random.normal(k_big, (N_BIG * NUM_CLIPS, C, H, W), jnp.float32)
    out_big = recognizer_forward(imgs_big, w1, b1, w2, b2, num_clips=NUM_CLIPS)
    out_big = jax.block_until_ready(out_big)
    ref_big = reference_forward(imgs_big, w1, b1, w2, b2, NUM_CLIPS)
    assert out_big.shape == (N_BIG, NUM_CLASSES)
    assert jnp.allclose(out_big, ref_big, atol=2e-5, rtol=2e-5), "mismatch vs reference (batched)"
    assert jnp.allclose(out_big.sum(axis=-1), jnp.ones((N_BIG,)), atol=1e-5)

    print("KERNEL_OK")
</pallas_src>

<mosaic_0001>
module attributes {stable_mosaic.version = 11 : i64} {
  func.func @recognizer_kernel(%arg0: i32, %arg1: memref<8x1024xbf16, #tpu.memory_space<vmem>>, %arg2: memref<1024x128xbf16, #tpu.memory_space<vmem>>, %arg3: memref<1x128xf32, #tpu.memory_space<vmem>>, %arg4: memref<128x128xf32, #tpu.memory_space<vmem>>, %arg5: memref<1x128xf32, #tpu.memory_space<vmem>>, %arg6: memref<2x8xf32, #tpu.memory_space<vmem>>, %arg7: memref<2x128xf32, #tpu.memory_space<vmem>>) attributes {dimension_semantics = [#tpu.dimension_semantics<parallel>], iteration_bounds = array<i64: 1>, scalar_prefetch = 0 : i64, scratch_operands = 0 : i64, tpu.core_type = #tpu.core_type<tc>, window_params = [{transform_indices = @transform_0, window_bounds = array<i64: 8, 1024>}, {pipeline_mode = #tpu.pipeline_mode<synchronous>, transform_indices = @transform_1, window_bounds = array<i64: 1024, 128>}, {pipeline_mode = #tpu.pipeline_mode<synchronous>, transform_indices = @transform_2, window_bounds = array<i64: 1, 128>}, {pipeline_mode = #tpu.pipeline_mode<synchronous>, transform_indices = @transform_3, window_bounds = array<i64: 128, 128>}, {pipeline_mode = #tpu.pipeline_mode<synchronous>, transform_indices = @transform_4, window_bounds = array<i64: 1, 128>}, {pipeline_mode = #tpu.pipeline_mode<synchronous>, transform_indices = @transform_5, window_bounds = array<i64: 2, 8>}, {transform_indices = @transform_6, window_bounds = array<i64: 2, 128>}]} {
    %c0 = arith.constant 0 : index
    %c0_0 = arith.constant 0 : index
    %0 = vector.load %arg1[%c0, %c0_0] : memref<8x1024xbf16, #tpu.memory_space<vmem>>, vector<8x1024xbf16>
    %c0_1 = arith.constant 0 : index
    %c0_2 = arith.constant 0 : index
    %1 = vector.load %arg2[%c0_1, %c0_2] : memref<1024x128xbf16, #tpu.memory_space<vmem>>, vector<1024x128xbf16>
    %cst = arith.constant dense<0.000000e+00> : vector<8x128xf32>
    %2 = tpu.matmul %0, %1, %cst {dimension_numbers = #tpu.dot_dimension_numbers<[1], [0], [0], [1], [0, 0, 1, 1], [], []>} : vector<8x1024xbf16>, vector<1024x128xbf16>, vector<8x128xf32> -> vector<8x128xf32>
    %c0_3 = arith.constant 0 : index
    %c0_4 = arith.constant 0 : index
    %3 = vector.load %arg3[%c0_3, %c0_4] : memref<1x128xf32, #tpu.memory_space<vmem>>, vector<1x128xf32>
    %4 = vector.broadcast %3 : vector<1x128xf32> to vector<8x128xf32>
    %5 = arith.addf %2, %4 : vector<8x128xf32>
    %cst_5 = arith.constant 0.000000e+00 : f32
    %6 = vector.broadcast %cst_5 : f32 to vector<8x128xf32>
    %7 = arith.maximumf %5, %6 : vector<8x128xf32>
    %c0_6 = arith.constant 0 : index
    %c0_7 = arith.constant 0 : index
    %8 = vector.load %arg4[%c0_6, %c0_7] : memref<128x128xf32, #tpu.memory_space<vmem>>, vector<128x128xf32>
    %cst_8 = arith.constant dense<0.000000e+00> : vector<8x128xf32>
    %9 = tpu.matmul %7, %8, %cst_8 {dimension_numbers = #tpu.dot_dimension_numbers<[1], [0], [0], [1], [0, 0, 1, 1], [], []>} : vector<8x128xf32>, vector<128x128xf32>, vector<8x128xf32> -> vector<8x128xf32>
    %c0_9 = arith.constant 0 : index
    %c0_10 = arith.constant 0 : index
    %10 = vector.load %arg5[%c0_9, %c0_10] : memref<1x128xf32, #tpu.memory_space<vmem>>, vector<1x128xf32>
    %11 = vector.broadcast %10 : vector<1x128xf32> to vector<8x128xf32>
    %12 = arith.addf %9, %11 : vector<8x128xf32>
    %cst_11 = arith.constant dense<0xFF800000> : vector<8xf32>
    %13 = vector.multi_reduction <maximumf>, %12, %cst_11 [1] : vector<8x128xf32> to vector<8xf32>
    %14 = vector.shape_cast %13 : vector<8xf32> to vector<8x1xf32>
    %15 = vector.broadcast %14 : vector<8x1xf32> to vector<8x128xf32>
    %16 = arith.subf %12, %15 : vector<8x128xf32>
    %17 = math.exp %16 : vector<8x128xf32>
    %cst_12 = arith.constant dense<0.000000e+00> : vector<8xf32>
    %18 = vector.multi_reduction <add>, %17, %cst_12 [1] : vector<8x128xf32> to vector<8xf32>
    %19 = vector.shape_cast %18 : vector<8xf32> to vector<8x1xf32>
    %20 = tpu.reciprocal %19 : vector<8x1xf32> -> vector<8x1xf32>
    %21 = vector.broadcast %20 : vector<8x1xf32> to vector<8x128xf32>
    %22 = arith.mulf %17, %21 : vector<8x128xf32>
    %c0_13 = arith.constant 0 : index
    %c0_14 = arith.constant 0 : index
    %23 = vector.load %arg6[%c0_13, %c0_14] : memref<2x8xf32, #tpu.memory_space<vmem>>, vector<2x8xf32>
    %cst_15 = arith.constant dense<0.000000e+00> : vector<2x128xf32>
    %24 = tpu.matmul %23, %22, %cst_15 {dimension_numbers = #tpu.dot_dimension_numbers<[1], [0], [0], [1], [0, 0, 1, 1], [], []>} : vector<2x8xf32>, vector<8x128xf32>, vector<2x128xf32> -> vector<2x128xf32>
    %c0_16 = arith.constant 0 : index
    %c0_17 = arith.constant 0 : index
    %25 = vector.load %arg7[%c0_16, %c0_17] : memref<2x128xf32, #tpu.memory_space<vmem>>, vector<2x128xf32>
    tpu.vector_store %arg7[%c0_16, %c0_17], %24 {strides = array<i32>} : memref<2x128xf32, #tpu.memory_space<vmem>>, vector<2x128xf32>,
    return
  }
  func.func @transform_0(%arg0: i32) -> (i32, i32) {
    %c0_i32 = arith.constant 0 : i32
    %c0_i32_0 = arith.constant 0 : i32
    return %arg0, %c0_i32 : i32, i32
  }
  func.func @transform_1(%arg0: i32) -> (i32, i32) {
    %c0_i32 = arith.constant 0 : i32
    %c0_i32_0 = arith.constant 0 : i32
    %c0_i32_1 = arith.constant 0 : i32
    return %c0_i32, %c0_i32_0 : i32, i32
  }
  func.func @transform_2(%arg0: i32) -> (i32, i32) {
    %c0_i32 = arith.constant 0 : i32
    %c0_i32_0 = arith.constant 0 : i32
    %c0_i32_1 = arith.constant 0 : i32
    return %c0_i32, %c0_i32_0 : i32, i32
  }
  func.func @transform_3(%arg0: i32) -> (i32, i32) {
    %c0_i32 = arith.constant 0 : i32
    %c0_i32_0 = arith.constant 0 : i32
    %c0_i32_1 = arith.constant 0 : i32
    return %c0_i32, %c0_i32_0 : i32, i32
  }
  func.func @transform_4(%arg0: i32) -> (i32, i32) {
    %c0_i32 = arith.constant 0 : i32
    %c0_i32_0 = arith.constant 0 : i32
    %c0_i32_1 = arith.constant 0 : i32
    return %c0_i32, %c0_i32_0 : i32, i32
  }
  func.func @transform_5(%arg0: i32) -> (i32, i32) {
    %c0_i32 = arith.constant 0 : i32
    %c0_i32_0 = arith.constant 0 : i32
    %c0_i32_1 = arith.constant 0 : i32
    return %c0_i32, %c0_i32_0 : i32, i32
  }
  func.func @transform_6(%arg0: i32) -> (i32, i32) {
    %c0_i32 = arith.constant 0 : i32
    %c0_i32_0 = arith.constant 0 : i32
    return %arg0, %c0_i32 : i32, i32
  }
}

</mosaic_0001>

<bundles_post_ra>
// kernel: tpu_custom_call.1
= control target key start
LH: loop header
LB: loop body
LE: loop exit
PB: predicated region body
PF: predicated region fallthrough
CT: control target
= control target key end

     0   :  { %11 = vsyncpa [#allocation3], 0  ;;  %s1372_s0 = inlined_call_operand.hbm [shape: bf16[8,1024], index: 0, kind: input, shape index: {}]   ;;  %s1373_s1 = inlined_call_operand.hbm [shape: bf16[1024,128], index: 1, kind: input, shape index: {}]   ;;  %s1374_s2 = inlined_call_operand.vmem [shape: f32[1,128], index: 2, kind: input, shape index: {}]   ;;  %s1375_s3 = inlined_call_operand.hbm [shape: f32[128,128], index: 3, kind: input, shape index: {}]   ;;  %s1376_s4 = inlined_call_operand.hbm [shape: f32[1,128], index: 4, kind: input, shape index: {}]   ;;  %s1377_s5 = inlined_call_operand.vmem [shape: f32[2,8], index: 5, kind: input, shape index: {}]   ;;  %s1378_s6 = inlined_call_operand.hbm [shape: f32[2,128], index: 6, kind: output, shape index: {}]  }
   0x1   :  { %12 = vsyncpa [#allocation6], 0 }
   0x2   :  { %13 = vsyncpa [#allocation9], 0  ;;  %s30_s23 = sshll.u32 %s1373_s1, 4  ;;  %s31_s23 = int_to_ptr.hbm [resolvable:$true] %s30_s23 }
   0x3   :  { %14 = vsyncpa [#allocation4], 0  ;;  %s1307_s24 = smov [#allocation5]   ;;  %s20_s28 = sshll.u32 %s1372_s0, 4  ;;  %s21_s28 = int_to_ptr.hbm [resolvable:$true] %s20_s28 }
   0x4   :  { %s32_s25 = sshll.u32 %s1307_s24, 4  ;;  %s1308_s29 = smov 64   ;;  %s33_s25 = int_to_ptr.vmem [resolvable:$true] %s32_s25 }
   0x5   :  { %s1309_s30 = smov 4   ;;  %s1310_s7 = smov [#allocation2]  }
   0x6   :  { %38 = dma.hbm_to_vmem [thread:$0]  %s31_s23, 8192, %s33_s25, [#allocation6], %s1308_s29, %s1308_s29, %s1309_s30  }
   0x7   :  { %s22_s8 = sshll.u32 %s1310_s7, 4  ;;  %s45_s11 = sshll.u32 %s1375_s3, 4  ;;  %s23_s8 = int_to_ptr.vmem [resolvable:$true] %s22_s8  ;;  %s46_s11 = int_to_ptr.hbm [resolvable:$true] %s45_s11 }
   0x8   :  { %25 = dma.hbm_to_vmem [thread:$0]  %s21_s28, 512, %s23_s8, [#allocation3]  }
   0x9   :  { %s1311_s1 = smov [#allocation7]   ;;  %s59_s0 = sshll.u32 %s1376_s4, 4  ;;  %s60_s0 = int_to_ptr.hbm [resolvable:$true] %s59_s0 }
   0xa   :  { %s47_s12 = sshll.u32 %s1311_s1, 4  ;;  %s1312_s15 = smov 128   ;;  %s48_s12 = int_to_ptr.vmem [resolvable:$true] %s47_s12 }
   0xb   :  { %s1313_s16 = smov 8   ;;  %s1314_s17 = smov [#allocation8]  }
   0xc   :  { %53 = dma.hbm_to_vmem [thread:$0]  %s46_s11, 2048, %s48_s12, [#allocation6], %s1312_s15, %s1312_s15, %s1313_s16  }
   0xd   :  { %s61_s18 = sshll.u32 %s1314_s17, 4  ;;  %s62_s18 = int_to_ptr.vmem [resolvable:$true] %s61_s18 }
   0xe   :  { %64 = dma.hbm_to_vmem [thread:$0]  %s60_s0, 16, %s62_s18, [#allocation9]  }
   0xf   :  { %1299 = dma.done.wait [#allocation3], 512  }
  0x10   :  { %1300 = vsyncadd [#allocation3], 4294966784 }
  0x11   :  { %1301 = dma.done.wait [#allocation6], 10240  }
  0x12   :  { %1302 = vsyncadd [#allocation6], 4294957056 }
  0x13   :  { %1303 = dma.done.wait [#allocation9], 16  }
  0x14   :  { %1304 = vsyncadd [#allocation9], 4294967280  ;;  %v1107_v0 = vld [vmem:[#allocation5 + $0x38] sm:$0xff]  ;;  %v1106_v4 = vld [vmem:[#allocation5 + $0x30] sm:$0xff]  ;;  %vm799_vm4 = vcmask 64512   ;;  %s1315_s20 = smov [#allocation10]  }
  0x15   :  { %v1115_v1 = vld [vmem:[#allocation5 + $0x78] sm:$0xff]  ;;  %631 = vmatpush.bf16.msra.mxu0 %v1107_v0  ;;  %v1114_v5 = vld [vmem:[#allocation5 + $0x70] sm:$0xff]  ;;  %v1105_v8 = vld [vmem:[#allocation5 + $0x28] sm:$0xff]  ;;  %s829_s21 = sshll.u32 %s1315_s20, 4  ;;  %s831_s24 = sshll.u32 %s1378_s6, 4  ;;  %s830_s21 = int_to_ptr.vmem [resolvable:$true] %s829_s21  ;;  %s832_s24 = int_to_ptr.hbm [resolvable:$true] %s831_s24 }
  0x16   :  { %v1123_v2 = vld [vmem:[#allocation5 + $0xb8] sm:$0xff]  ;;  %644 = vmatpush.bf16.msra.mxu1 %v1115_v1  ;;  %v1122_v6 = vld [vmem:[#allocation5 + $0xb0] sm:$0xff]  ;;  %v1113_v9 = vld [vmem:[#allocation5 + $0x68] sm:$0xff] }
  0x17   :  { %v1131_v3 = vld [vmem:[#allocation5 + $0xf8] sm:$0xff]  ;;  %657 = vmatpush.bf16.msra.mxu2 %v1123_v2  ;;  %v1130_v7 = vld [vmem:[#allocation5 + $0xf0] sm:$0xff]  ;;  %v1121_v10 = vld [vmem:[#allocation5 + $0xa8] sm:$0xff] }
  0x18   :  { %670 = vmatpush.bf16.msra.mxu3 %v1131_v3  ;;  %v1129_v11 = vld [vmem:[#allocation5 + $0xe8] sm:$0xff]  ;;  %v1104_v12 = vld [vmem:[#allocation5 + $0x20] sm:$0xff]  ;;  %v1103_v16 = vld [vmem:[#allocation5 + $0x18] sm:$0xff] }
  0x19   :  { %632 = vmatpush.bf16.msra.mxu0 %v1106_v4  ;;  %v1112_v13 = vld [vmem:[#allocation5 + $0x60] sm:$0xff]  ;;  %v1111_v17 = vld [vmem:[#allocation5 + $0x58] sm:$0xff]  ;;  %v1102_v20 = vld [vmem:[#allocation5 + $0x10] sm:$0xff] }
  0x1a   :  { %645 = vmatpush.bf16.msra.mxu1 %v1114_v5  ;;  %v1120_v14 = vld [vmem:[#allocation5 + $0xa0] sm:$0xff]  ;;  %v1119_v18 = vld [vmem:[#allocation5 + $0x98] sm:$0xff]  ;;  %v1110_v21 = vld [vmem:[#allocation5 + $0x50] sm:$0xff] }
  0x1b   :  { %658 = vmatpush.bf16.msra.mxu2 %v1122_v6  ;;  %v1128_v15 = vld [vmem:[#allocation5 + $0xe0] sm:$0xff]  ;;  %v1127_v19 = vld [vmem:[#allocation5 + $0xd8] sm:$0xff]  ;;  %v1118_v22 = vld [vmem:[#allocation5 + $0x90] sm:$0xff] }
  0x1c   :  { %671 = vmatpush.bf16.msra.mxu3 %v1130_v7  ;;  %v1126_v23 = vld [vmem:[#allocation5 + $0xd0] sm:$0xff]  ;;  %v1101_v24 = vld [vmem:[#allocation5 + $0x8] sm:$0xff]  ;;  %v83_v29 = vld [vmem:[#allocation2] sm:$0xff] }
  0x1d   :  { %633 = vmatpush.bf16.msra.mxu0 %v1105_v8  ;;  %v1109_v25 = vld [vmem:[#allocation5 + $0x48] sm:$0xff]  ;;  %v1100_v30 = vld [vmem:[#allocation5] sm:$0xff]  ;;  %v223_v33 = vunpack.c.l.b16 %v83_v29  ;;  %v224_v37 = vunpack.c.h.b16 %v83_v29  ;;  %v1139_v38 = vld [vmem:[#allocation5 + $0x138] sm:$0xff] }
  0x1e   :  { %646 = vmatpush.bf16.msra.mxu1 %v1113_v9  ;;  %v1117_v26 = vld [vmem:[#allocation5 + $0x88] sm:$0xff]  ;;  %v1108_v31 = vld [vmem:[#allocation5 + $0x40] sm:$0xff]  ;;  %v1147_v39 = vld [vmem:[#allocation5 + $0x178] sm:$0xff] }
  0x1f   :  { %659 = vmatpush.bf16.msra.mxu2 %v1121_v10  ;;  %v1125_v27 = vld [vmem:[#allocation5 + $0xc8] sm:$0xff]  ;;  %v1116_v34 = vld [vmem:[#allocation5 + $0x80] sm:$0xff]  ;;  %v1155_v40 = vld [vmem:[#allocation5 + $0x1b8] sm:$0xff]  ;;  %v231_v43 = vpack.c.b16 %v223_v33, %v223_v33  ;;  %v232_v45 = vpack.c.b16 %v224_v37, %v224_v37 }
  0x20   :  { %672 = vmatpush.bf16.msra.mxu3 %v1129_v11  ;;  %v84_v28 = vld [vmem:[#allocation2 + $0x8] sm:$0xff]  ;;  %v1124_v35 = vld [vmem:[#allocation5 + $0xc0] sm:$0xff]  ;;  %v1163_v41 = vld [vmem:[#allocation5 + $0x1f8] sm:$0xff] }
  0x21   :  { %634 = vmatpush.bf16.msra.mxu0 %v1104_v12  ;;  %v225_v32 = vunpack.c.l.b16 %v84_v28  ;;  %v226_v36 = vunpack.c.h.b16 %v84_v28  ;;  %v1138_v46 = vld [vmem:[#allocation5 + $0x130] sm:$0xff]  ;;  %v1137_v50 = vld [vmem:[#allocation5 + $0x128] sm:$0xff]  ;;  %v1136_v54 = vld [vmem:[#allocation5 + $0x120] sm:$0xff] }
  0x22   :  { %647 = vmatpush.bf16.msra.mxu1 %v1112_v13  ;;  %v1146_v47 = vld [vmem:[#allocation5 + $0x170] sm:$0xff]  ;;  %v1145_v51 = vld [vmem:[#allocation5 + $0x168] sm:$0xff]  ;;  %v1144_v55 = vld [vmem:[#allocation5 + $0x160] sm:$0xff] }
  0x23   :  { %660 = vmatpush.bf16.msra.mxu2 %v1120_v14  ;;  %v233_v42 = vpack.c.b16 %v225_v32, %v225_v32  ;;  %v234_v44 = vpack.c.b16 %v226_v36, %v226_v36  ;;  %v1154_v48 = vld [vmem:[#allocation5 + $0x1b0] sm:$0xff]  ;;  %v1153_v52 = vld [vmem:[#allocation5 + $0x1a8] sm:$0xff]  ;;  %v1152_v56 = vld [vmem:[#allocation5 + $0x1a0] sm:$0xff] }
  0x24   :  { %673 = vmatpush.bf16.msra.mxu3 %v1128_v15  ;;  %v1162_v49 = vld [vmem:[#allocation5 + $0x1f0] sm:$0xff]  ;;  %v1161_v53 = vld [vmem:[#allocation5 + $0x1e8] sm:$0xff]  ;;  %v1160_v57 = vld [vmem:[#allocation5 + $0x1e0] sm:$0xff] }
  0x25   :  { %635 = vmatpush.bf16.msra.mxu0 %v1103_v16  ;;  %v1135_v58 = vld [vmem:[#allocation5 + $0x118] sm:$0xff]  ;;  %v1134_v62 = vld [vmem:[#allocation5 + $0x110] sm:$0xff]  ;;  %v1133_v2 = vld [vmem:[#allocation5 + $0x108] sm:$0xff] }
  0x26   :  { %648 = vmatpush.bf16.msra.mxu1 %v1111_v17  ;;  %v1143_v59 = vld [vmem:[#allocation5 + $0x158] sm:$0xff]  ;;  %v1142_v63 = vld [vmem:[#allocation5 + $0x150] sm:$0xff]  ;;  %v1141_v3 = vld [vmem:[#allocation5 + $0x148] sm:$0xff] }
  0x27   :  { %661 = vmatpush.bf16.msra.mxu2 %v1119_v18  ;;  %v1151_v60 = vld [vmem:[#allocation5 + $0x198] sm:$0xff]  ;;  %v1150_v0 = vld [vmem:[#allocation5 + $0x190] sm:$0xff]  ;;  %v1149_v5 = vld [vmem:[#allocation5 + $0x188] sm:$0xff] }
  0x28   :  { %674 = vmatpush.bf16.msra.mxu3 %v1127_v19  ;;  %v1159_v61 = vld [vmem:[#allocation5 + $0x1d8] sm:$0xff]  ;;  %v1158_v1 = vld [vmem:[#allocation5 + $0x1d0] sm:$0xff]  ;;  %v1157_v6 = vld [vmem:[#allocation5 + $0x1c8] sm:$0xff] }
  0x29   :  { %636 = vmatpush.bf16.msra.mxu0 %v1102_v20  ;;  %v85_v4 = vld [vmem:[#allocation2 + $0x10] sm:$0xff]  ;;  %v86_v7 = vld [vmem:[#allocation2 + $0x18] sm:$0xff]  ;;  %v1132_v10 = vld [vmem:[#allocation5 + $0x100] sm:$0xff] }
  0x2a   :  { %649 = vmatpush.bf16.msra.mxu1 %v1110_v21  ;;  %v227_v8 = vunpack.c.l.b16 %v85_v4  ;;  %v228_v9 = vunpack.c.h.b16 %v85_v4  ;;  %v1140_v11 = vld [vmem:[#allocation5 + $0x140] sm:$0xff]  ;;  %v229_v12 = vunpack.c.l.b16 %v86_v7  ;;  %v230_v13 = vunpack.c.h.b16 %v86_v7  ;;  %v751_v20 = vld [vmem:[#allocation7 + $0x78] sm:$0xff]  ;;  %v750_v21 = vld [vmem:[#allocation7 + $0x70] sm:$0xff] }
  0x2b   :  { %662 = vmatpush.bf16.msra.mxu2 %v1118_v22  ;;  %v1148_v14 = vld [vmem:[#allocation5 + $0x180] sm:$0xff]  ;;  %v749_v22 = vld [vmem:[#allocation7 + $0x68] sm:$0xff]  ;;  %v743_v28 = vld [vmem:[#allocation7 + $0x38] sm:$0xff] }
  0x2c   :  { %675 = vmatpush.bf16.msra.mxu3 %v1126_v23  ;;  %v1156_v15 = vld [vmem:[#allocation5 + $0x1c0] sm:$0xff]  ;;  %v235_v16 = vpack.c.b16 %v227_v8, %v227_v8  ;;  %v236_v17 = vpack.c.b16 %v228_v9, %v228_v9  ;;  %v237_v18 = vpack.c.b16 %v229_v12, %v229_v12  ;;  %v238_v19 = vpack.c.b16 %v230_v13, %v230_v13  ;;  %v742_v29 = vld [vmem:[#allocation7 + $0x30] sm:$0xff] }
  0x2d   :  { %637 = vmatpush.bf16.msra.mxu0 %v1101_v24  ;;  %v748_v23 = vld [vmem:[#allocation7 + $0x60] sm:$0xff]  ;;  %v747_v24 = vld [vmem:[#allocation7 + $0x58] sm:$0xff] }
  0x2e   :  { %650 = vmatpush.bf16.msra.mxu1 %v1109_v25  ;;  %v746_v25 = vld [vmem:[#allocation7 + $0x50] sm:$0xff]  ;;  %v740_v32 = vld [vmem:[#allocation7 + $0x20] sm:$0xff] }
  0x2f   :  { %663 = vmatpush.bf16.msra.mxu2 %v1117_v26  ;;  %v745_v26 = vld [vmem:[#allocation7 + $0x48] sm:$0xff] }
  0x30   :  { %676 = vmatpush.bf16.msra.mxu3 %v1125_v27  ;;  %v744_v27 = vld [vmem:[#allocation7 + $0x40] sm:$0xff] }
  0x31   :  { %638 = vmatpush.bf16.msra.mxu0 %v1100_v30  ;;  %v741_v30 = vld [vmem:[#allocation7 + $0x28] sm:$0xff] }
  0x32   :  { %651 = vmatpush.bf16.msra.mxu1 %v1108_v31 }
  0x33   :  { %664 = vmatpush.bf16.msra.mxu2 %v1116_v34  ;;  %v739_v34 = vld [vmem:[#allocation7 + $0x18] sm:$0xff] }
  0x34   :  { %677 = vmatpush.bf16.msra.mxu3 %v1124_v35  ;;  %639 = vmatmul.bf16.vlgmr.msra.gmra.mxu0 %v231_v43  ;;  %v738_v35 = vld [vmem:[#allocation7 + $0x10] sm:$0xff] }
  0x35   :  { %683 = vmatpush.bf16.msrb.mxu0 %v1139_v38  ;;  %652 = vmatmul.bf16.vlgmr.msra.gmra.mxu1 %v232_v45  ;;  %v737_v38 = vld [vmem:[#allocation7 + $0x8] sm:$0xff] }
  0x36   :  { %696 = vmatpush.bf16.msrb.mxu1 %v1147_v39  ;;  %665 = vmatmul.bf16.vlgmr.msra.gmra.mxu2 %v233_v42  ;;  %v1173_v42 = vld [vmem:[%s1374_s2] ss:$0 sm:$0xff] }
  0x37   :  { %709 = vmatpush.bf16.msrb.mxu2 %v1155_v40  ;;  %678 = vmatmul.bf16.vlgmr.msra.gmra.mxu3 %v234_v44 }
  0x38   :  { %722 = vmatpush.bf16.msrb.mxu3 %v1163_v41  ;;  %v736_v41 = vld [vmem:[#allocation7] sm:$0xff] }
  0x39   :  { %684 = vmatpush.bf16.msrb.mxu0 %v1138_v46 }
  0x3a   :  { %697 = vmatpush.bf16.msrb.mxu1 %v1146_v47 }
  0x3b   :  { %710 = vmatpush.bf16.msrb.mxu2 %v1154_v48 }
  0x3c   :  { %723 = vmatpush.bf16.msrb.mxu3 %v1162_v49 }
  0x3d   :  { %685 = vmatpush.bf16.msrb.mxu0 %v1137_v50 }
  0x3e   :  { %698 = vmatpush.bf16.msrb.mxu1 %v1145_v51 }
  0x3f   :  { %711 = vmatpush.bf16.msrb.mxu2 %v1153_v52 }
  0x40   :  { %724 = vmatpush.bf16.msrb.mxu3 %v1161_v53 }
  0x41   :  { %686 = vmatpush.bf16.msrb.mxu0 %v1136_v54 }
  0x42   :  { %699 = vmatpush.bf16.msrb.mxu1 %v1144_v55 }
  0x43   :  { %712 = vmatpush.bf16.msrb.mxu2 %v1152_v56 }
  0x44   :  { %725 = vmatpush.bf16.msrb.mxu3 %v1160_v57 }
  0x45   :  { %687 = vmatpush.bf16.msrb.mxu0 %v1135_v58 }
  0x46   :  { %700 = vmatpush.bf16.msrb.mxu1 %v1143_v59 }
  0x47   :  { %713 = vmatpush.bf16.msrb.mxu2 %v1151_v60 }
  0x48   :  { %726 = vmatpush.bf16.msrb.mxu3 %v1159_v61 }
  0x49   :  { %688 = vmatpush.bf16.msrb.mxu0 %v1134_v62  ;;  %v1174_v62 = vld [vmem:[#allocation8] ss:$0 sm:$0xff] }
  0x4a   :  { %701 = vmatpush.bf16.msrb.mxu1 %v1142_v63 }
  0x4b   :  { %714 = vmatpush.bf16.msrb.mxu2 %v1150_v0 }
  0x4c   :  { %727 = vmatpush.bf16.msrb.mxu3 %v1158_v1 }
  0x4d   :  { %689 = vmatpush.bf16.msrb.mxu0 %v1133_v2 }
  0x4e   :  { %702 = vmatpush.bf16.msrb.mxu1 %v1141_v3 }
  0x4f   :  { %715 = vmatpush.bf16.msrb.mxu2 %v1149_v5 }
  0x50   :  { %728 = vmatpush.bf16.msrb.mxu3 %v1157_v6 }
  0x51   :  { %690 = vmatpush.bf16.msrb.mxu0 %v1132_v10 }
  0x52   :  { %703 = vmatpush.bf16.msrb.mxu1 %v1140_v11 }
  0x53   :  { %716 = vmatpush.bf16.msrb.mxu2 %v1148_v14 }
  0x54   :  { %729 = vmatpush.bf16.msrb.mxu3 %v1156_v15  ;;  %691 = vmatmul.bf16.vlgmr.msrb.gmra.mxu0 %v235_v16 }
  0x55   :  { %704 = vmatmul.bf16.vlgmr.msrb.gmra.mxu1 %v236_v17  ;;  %756 = vmatpush.msra.mxu0 %v751_v20  ;;  %v798_v17 = vld [vmem:[%s1377_s5] sm:$0x3] }
  0x56   :  { %717 = vmatmul.bf16.vlgmr.msrb.gmra.mxu2 %v237_v18 }
  0x57   :  { %730 = vmatmul.bf16.vlgmr.msrb.gmra.mxu3 %v238_v19  ;;  %757 = vmatpush.msra.mxu0 %v750_v21 }
  0x59   :  { %758 = vmatpush.msra.mxu0 %v749_v22 }
  0x5b   :  { %759 = vmatpush.msra.mxu0 %v748_v23 }
  0x5d   :  { %760 = vmatpush.msra.mxu0 %v747_v24 }
  0x5f   :  { %761 = vmatpush.msra.mxu0 %v746_v25 }
  0x61   :  { %762 = vmatpush.msra.mxu0 %v745_v26 }
  0x63   :  { %763 = vmatpush.msra.mxu0 %v744_v27 }
  0x65   :  { %764 = vmatpush.msra.mxu0 %v743_v28 }
  0x67   :  { %765 = vmatpush.msra.mxu0 %v742_v29 }
  0x69   :  { %766 = vmatpush.msra.mxu0 %v741_v30 }
  0x6b   :  { %767 = vmatpush.msra.mxu0 %v740_v32 }
  0x6d   :  { %768 = vmatpush.msra.mxu0 %v739_v34 }
  0x6f   :  { %769 = vmatpush.msra.mxu0 %v738_v35 }
  0x71   :  { %770 = vmatpush.msra.mxu0 %v737_v38 }
  0x73   :  { %771 = vmatpush.msra.mxu0 %v736_v41 }
  0xb1   :  { %v640_v31 = vpop.f32.mrf.mxu0 }
  0xb2   :  { %v653_v33 = vpop.f32.mrf.mxu1  ;;  %v641_v45 = vadd.f32 %v1173_v42, %v640_v31 }
  0xb4   :  { %v654_v46 = vadd.f32 %v653_v33, %v641_v45 }
  0xb9   :  { %v666_v36 = vpop.f32.mrf.mxu2  ;;  %v642_v39 = vpop.f32.mrf.mxu0 }
  0xba   :  { %v679_v37 = vpop.f32.mrf.mxu3  ;;  %v655_v40 = vpop.f32.mrf.mxu1  ;;  %v667_v47 = vadd.f32 %v666_v36, %v654_v46 }
  0xbc   :  { %v680_v48 = vadd.f32 %v679_v37, %v667_v47 }
  0xc1   :  { %v668_v43 = vpop.f32.mrf.mxu2 }
  0xc2   :  { %v681_v44 = vpop.f32.mrf.mxu3 }
  0xd1   :  { %v692_v49 = vpop.f32.mrf.mxu0 }
  0xd2   :  { %v705_v50 = vpop.f32.mrf.mxu1  ;;  %v693_v51 = vadd.f32 %v692_v49, %v680_v48 }
  0xd4   :  { %v706_v52 = vadd.f32 %v705_v50, %v693_v51 }
  0xd9   :  { %v718_v53 = vpop.f32.mrf.mxu2  ;;  %v694_v56 = vpop.f32.mrf.mxu0 }
  0xda   :  { %v731_v54 = vpop.f32.mrf.mxu3  ;;  %v719_v55 = vadd.f32 %v718_v53, %v706_v52  ;;  %v707_v57 = vpop.f32.mrf.mxu1 }
  0xdc   :  { %v732_v58 = vadd.f32 %v731_v54, %v719_v55 }
  0xde   :  { %v735_v59 = vmax.f32 %v732_v58, 0.0 }
  0xe0   :  { %772 = vmatmul.f32.vlgmr.msra.gmra.mxu0 %v735_v59 }
  0xe1   :  { %v720_v60 = vpop.f32.mrf.mxu2 }
  0xe2   :  { %v733_v61 = vpop.f32.mrf.mxu3 }
 0x15d   :  { %v773_v63 = vpop.f32.mrf.mxu0 }
 0x15e   :  { %v774_v0 = vadd.f32 %v1174_v62, %v773_v63 }
 0x160   :  { %776 = vmax.xlane.f32.xlu0 %v774_v0 }
 0x1d3   :  { %v777_v1 = vpop.xlane.xlu0 %776 }
 0x1d4   :  { %v778_v2 = vsub.f32 %v774_v0, %v777_v1 }
 0x1d6   :  { %v779_v3 = vmul.f32 1.442695, %v778_v2 }
 0x1d8   :  { %1175 = vpow2.f32 %v779_v3 }
 0x1de   :  { %v1176_v4 = vpop.eup %1175 }
 0x1df   :  { %781 = vadd.xlane.f32.xlu0 %v1176_v4 }
 0x252   :  { %v782_v5 = vpop.xlane.xlu0 %781 }
 0x253   :  { %1177 = vrcp.f32 %v782_v5  ;;  %v794_v9 = vand.u32 2147483648, %v782_v5  ;;  %v792_v11 = vand.u32 2147483647, %v782_v5  ;;  %vm788_vm1 = vweird.f32 %v782_v5 }
 0x255   :  { %v795_v13 = vor.u32 1.1754944e-38, %v794_v9  ;;  %vm793_vm3 = vcmp.eq.f32.partialorder %v792_v11, 8.507059e+37 }
 0x259   :  { %v1178_v6 = vpop.eup %1177 }
 0x25a   :  { %v784_v7 = vmul.f32 %v1178_v6, %v782_v5  ;;  %vm789_vm0 = vweird.f32 %v1178_v6 }
 0x25b   :  { %vm790_vm2 = vmor %vm788_vm1, %vm789_vm0 }
 0x25c   :  { %v785_v8 = vsub.f32 1.0, %v784_v7 }
 0x25e   :  { %v786_v10 = vmul.f32 %v1178_v6, %v785_v8 }
 0x260   :  { %v787_v12 = vadd.f32 %v1178_v6, %v786_v10 }
 0x262   :  { %v791_v14 = vsel %vm790_vm2, %v1178_v6, %v787_v12 }
 0x263   :  { %v796_v15 = vsel %vm793_vm3, %v795_v13, %v791_v14 }
 0x264   :  { %v797_v16 = vmul.f32 %v1176_v4, %v796_v15 }
 0x266   :  { %818 = vmatpush.msra.mxu1 %v797_v16 }
 0x267   :  { %1099 = vmatmul.msk.f32.vlgmr.msra.gmra.mxu1 %vm799_vm4, %v798_v17 }
 0x2e4   :  { %v820_v18 = vpop.f32.mrf.mxu1 }
 0x2e5   :  { %823 = vst [vmem:[#allocation10] sm:$0x3] %v820_v18 }
 0x2e6   :  { %834 = dma.vmem_to_hbm [thread:$0]  %s830_s21, 32, %s832_s24, [#allocation4]  }
 0x2e7   :  { %1305 = dma.done.wait [#allocation4], 32  }
 0x2e8   :  { %1306 = vsyncadd [#allocation4], 4294967264 }
 0x2e9   :  { %839 = vsyncpa [#allocation3], 1 }
 0x2ea   :  { %840 = vsyncpa [#allocation6], 1 }
 0x2eb   :  { %841 = vsyncpa [#allocation9], 1 }
 0x2ec   :  { %842 = vsyncpa [#allocation4], 1 }

</bundles_post_ra>
